<compile_context>
chip_gen: v5e
topology: v5e:2x2
jax: 0.10.0
libtpu: 0.0.40
codegen_flags: <defaults>
</compile_context>

<pallas_src>
import jax
import jax.numpy as jnp
from jax.experimental import pallas as pl
from jax.experimental.pallas import tpu as pltpu


def _pointwise_conv_kernel(x_ref, w_ref, o_ref):
    # x_ref: (C_in, tile_s), w_ref: (tile_co, C_in), o_ref: (tile_co, tile_s)
    o_ref[...] = jnp.dot(
        w_ref[...], x_ref[...], preferred_element_type=jnp.float32
    ).astype(o_ref.dtype)


def _vmem_caps():
    """Return (working-set budget, vmem_limit cap) in bytes, per generation."""
    try:
        cap = pltpu.get_tpu_info().vmem_capacity_bytes
    except Exception:
        cap = 64 << 20  # conservative fallback: v7x per-TC physical VMEM
    if cap >= (96 << 20):
        # v5e / v6e: 128 MiB physical VMEM per TensorCore.
        return 48 << 20, 96 << 20
    # v7x: 64 MiB per TC; leave headroom for compiler scratch / intermediates.
    return 24 << 20, 48 << 20


def _per_step_bytes(c_in, tile_co, tile_s, in_isz, out_isz):
    b = 2 * c_in * tile_s * in_isz        # x tile (double-buffered)
    b += 2 * tile_co * tile_s * out_isz   # out tile (double-buffered)
    b += 2 * tile_co * c_in * in_isz      # weight tile (double-buffered)
    if out_isz < 4:
        b += tile_co * tile_s * 4         # f32 dot intermediate before cast
    return b


def _choose_tiles(n, hw, c_in, c_out, in_isz, out_isz, budget):
    # C_out tile: whole thing when small, else 256 (MXU-native on v6e/v7x,
    # multiple of v5e's 128x128).
    tile_co = c_out if c_out <= 256 else 256

    if hw < 128:
        # Full-extent spatial block (always a legal block shape).
        return tile_co, hw

    tile_s = 128
    while True:
        # Stop once the per-step x DMA is comfortably large (>= ~1 MiB) and we
        # have at least a 2048-lane tile, or at the hard 8192 cap.
        if tile_s >= 8192 or (tile_s >= 2048 and c_in * tile_s * in_isz >= (1 << 20)):
            break
        nxt = tile_s * 2
        if nxt > hw:
            break
        if _per_step_bytes(c_in, tile_co, nxt, in_isz, out_isz) > budget:
            break
        tile_s = nxt

    # v7x megacore: if the batch axis alone cannot feed two TensorCores, make
    # sure the (parallel) spatial axis has at least two steps.
    if n == 1:
        while tile_s > 128 and pl.cdiv(hw, tile_s) < 2:
            tile_s //= 2
    return tile_co, tile_s


def pointwise_conv(x_nchw, weight_oi, *, compute_dtype=None, out_dtype=None):
    """1x1 conv, bias=False (PointWiseConv forward).

    x_nchw:        (N, C_in, H, W)
    weight_oi:     (C_out, C_in)  (PyTorch's (C_out, C_in, 1, 1) squeezed)
    compute_dtype: optional operand dtype for the matmul (e.g. jnp.bfloat16);
                   accumulation is always f32.
    out_dtype:     optional output dtype (defaults to x's dtype).
    returns:       (N, C_out, H, W)
    """
    n, c_in, h, w = x_nchw.shape
    c_out = weight_oi.shape[0]
    hw = h * w

    out_dt = jnp.dtype(out_dtype) if out_dtype is not None else jnp.dtype(x_nchw.dtype)
    in_dt = jnp.dtype(compute_dtype) if compute_dtype is not None else jnp.dtype(x_nchw.dtype)

    budget, vmem_cap = _vmem_caps()
    tile_co, tile_s = _choose_tiles(
        n, hw, c_in, c_out, in_dt.itemsize, out_dt.itemsize, budget
    )

    # Free reshape: merging the trailing dims of a row-major NCHW tensor.
    x3 = x_nchw.reshape(n, c_in, hw)
    w2 = weight_oi
    if compute_dtype is not None:
        x3 = x3.astype(compute_dtype)
        w2 = w2.astype(compute_dtype)

    grid = (n, pl.cdiv(hw, tile_s), pl.cdiv(c_out, tile_co))

    per_step = _per_step_bytes(c_in, tile_co, tile_s, in_dt.itemsize, out_dt.itemsize)
    vmem_limit = int(min(max(per_step + (4 << 20), 16 << 20), vmem_cap))

    cost = pl.CostEstimate(
        flops=2 * n * hw * c_in * c_out,
        transcendentals=0,
        bytes_accessed=(n * c_in * hw * in_dt.itemsize
                        + c_out * c_in * in_dt.itemsize
                        + n * c_out * hw * out_dt.itemsize),
    )

    y3 = pl.pallas_call(
        _pointwise_conv_kernel,
        out_shape=jax.ShapeDtypeStruct((n, c_out, hw), out_dt),
        grid_spec=pltpu.PrefetchScalarGridSpec(
            num_scalar_prefetch=0,
            grid=grid,
            in_specs=[
                # x[b] tile: (C_in, tile_s). Index map is independent of the
                # innermost co axis, so the activation block stays VMEM
                # resident (not re-DMA'd) across all C_out tiles.
                pl.BlockSpec((None, c_in, tile_s), lambda b, s, j: (b, 0, s)),
                # Weight tile (tile_co, C_in): small; re-fetched per co step.
                pl.BlockSpec((tile_co, c_in), lambda b, s, j: (j, 0)),
            ],
            out_specs=pl.BlockSpec(
                (None, tile_co, tile_s), lambda b, s, j: (b, j, s)
            ),
        ),
        compiler_params=pltpu.CompilerParams(
            # Batch & spatial axes shard across v7x TensorCores; innermost
            # C_out axis is sequential ("arbitrary") so x residency is reused.
            dimension_semantics=("parallel", "parallel", "arbitrary"),
            vmem_limit_bytes=vmem_limit,
        ),
        cost_estimate=cost,
    )(x3, w2)

    # Free reshape back to NCHW (no transpose, no slice).
    return y3.reshape(n, c_out, h, w)


if __name__ == "__main__":
    key = jax.random.PRNGKey(0)
    k_x, k_w = jax.random.split(key)

    N, C_IN, C_OUT, H, W = 2, 4, 8, 16, 16

    x = jax.random.normal(k_x, (N, C_IN, H, W), dtype=jnp.float32)
    # Init consistent with nn.Conv2d(in, out, 1, bias=False): weight shape
    # (C_OUT, C_IN, 1, 1) squeezed to (C_OUT, C_IN).
    bound = 1.0 / (C_IN ** 0.5)
    weight = jax.random.uniform(
        k_w, (C_OUT, C_IN), minval=-bound, maxval=bound, dtype=jnp.float32
    )

    ref = jnp.einsum("nchw,oc->nohw", x, weight)

    # Exact-f32 path (matches the PyTorch module's semantics).
    out = pointwise_conv(x, weight)
    out = jax.block_until_ready(out)
    assert out.shape == (N, C_OUT, H, W)
    assert jnp.allclose(out, ref, atol=1e-5, rtol=1e-5)

    # bf16-operand / f32-accumulate path (HBM-traffic optimization); looser
    # tolerance accounts for bf16 operand rounding.
    out_bf16 = pointwise_conv(x, weight, compute_dtype=jnp.bfloat16)
    out_bf16 = jax.block_until_ready(out_bf16)
    assert out_bf16.shape == (N, C_OUT, H, W)
    assert jnp.allclose(out_bf16, ref, atol=6e-2, rtol=6e-2)

    # Non-tile-multiple HW / C_out: exercises the clipped partial-block path
    # (no wrapper pad/slice HBM passes).
    N2, C_IN2, C_OUT2, H2, W2 = 1, 3, 5, 13, 11
    x2 = jax.random.normal(k_x, (N2, C_IN2, H2, W2), dtype=jnp.float32)
    w2 = jax.random.uniform(
        k_w, (C_OUT2, C_IN2), minval=-1.0, maxval=1.0, dtype=jnp.float32
    )
    ref2 = jnp.einsum("nchw,oc->nohw", x2, w2)
    out2 = jax.block_until_ready(pointwise_conv(x2, w2))
    assert out2.shape == (N2, C_OUT2, H2, W2)
    assert jnp.allclose(out2, ref2, atol=1e-5, rtol=1e-5)

    print("KERNEL_OK")
</pallas_src>

<mosaic_0001>
module attributes {stable_mosaic.version = 11 : i64} {
  func.func @_pointwise_conv_kernel(%arg0: i32, %arg1: i32, %arg2: i32, %arg3: memref<1x4x256xf32, #tpu.memory_space<vmem>>, %arg4: memref<8x4xf32, #tpu.memory_space<vmem>>, %arg5: memref<1x8x256xf32, #tpu.memory_space<vmem>>) attributes {dimension_semantics = [#tpu.dimension_semantics<parallel>, #tpu.dimension_semantics<parallel>, #tpu.dimension_semantics<arbitrary>], iteration_bounds = array<i64: 2, 1, 1>, scalar_prefetch = 0 : i64, scratch_operands = 0 : i64, tpu.core_type = #tpu.core_type<tc>, window_params = [{transform_indices = @transform_0, window_bounds = array<i64: 1, 4, 256>}, {transform_indices = @transform_1, window_bounds = array<i64: 8, 4>}, {transform_indices = @transform_2, window_bounds = array<i64: 1, 8, 256>}]} {
    %c0 = arith.constant 0 : index
    %c0_0 = arith.constant 0 : index
    %0 = vector.load %arg4[%c0, %c0_0] : memref<8x4xf32, #tpu.memory_space<vmem>>, vector<8x4xf32>
    %c0_1 = arith.constant 0 : index
    %c0_2 = arith.constant 0 : index
    %c0_3 = arith.constant 0 : index
    %1 = vector.load %arg3[%c0_1, %c0_2, %c0_3] : memref<1x4x256xf32, #tpu.memory_space<vmem>>, vector<1x4x256xf32>
    %2 = vector.shape_cast %1 : vector<1x4x256xf32> to vector<4x256xf32>
    %cst = arith.constant dense<0.000000e+00> : vector<8x256xf32>
    %3 = tpu.matmul %0, %2, %cst {dimension_numbers = #tpu.dot_dimension_numbers<[1], [0], [0], [1], [0, 0, 1, 1], [], []>} : vector<8x4xf32>, vector<4x256xf32>, vector<8x256xf32> -> vector<8x256xf32>
    %c0_4 = arith.constant 0 : index
    %c0_5 = arith.constant 0 : index
    %c0_6 = arith.constant 0 : index
    %4 = vector.load %arg5[%c0_4, %c0_5, %c0_6] : memref<1x8x256xf32, #tpu.memory_space<vmem>>, vector<1x8x256xf32>
    %5 = vector.shape_cast %4 : vector<1x8x256xf32> to vector<8x256xf32>
    %6 = vector.shape_cast %3 : vector<8x256xf32> to vector<1x8x256xf32>
    tpu.vector_store %arg5[%c0_4, %c0_5, %c0_6], %6 {strides = array<i32>} : memref<1x8x256xf32, #tpu.memory_space<vmem>>, vector<1x8x256xf32>,
    return
  }
  func.func @transform_0(%arg0: i32, %arg1: i32, %arg2: i32) -> (i32, i32, i32) {
    %c0_i32 = arith.constant 0 : i32
    %c0_i32_0 = arith.constant 0 : i32
    return %arg0, %c0_i32, %arg1 : i32, i32, i32
  }
  func.func @transform_1(%arg0: i32, %arg1: i32, %arg2: i32) -> (i32, i32) {
    %c0_i32 = arith.constant 0 : i32
    %c0_i32_0 = arith.constant 0 : i32
    return %arg2, %c0_i32 : i32, i32
  }
  func.func @transform_2(%arg0: i32, %arg1: i32, %arg2: i32) -> (i32, i32, i32) {
    %c0_i32 = arith.constant 0 : i32
    return %arg0, %arg2, %arg1 : i32, i32, i32
  }
}

</mosaic_0001>

<bundles_post_ra>
// kernel: tpu_custom_call.1
= control target key start
LH: loop header
LB: loop body
LE: loop exit
PB: predicated region body
PF: predicated region fallthrough
CT: control target
= control target key end

     0   :  { %7 = vsyncpa [#allocation3], 0  ;;  %s727_s0 = inlined_call_operand.hbm [shape: f32[2,4,256], index: 0, kind: input, shape index: {}]   ;;  %s728_s1 = inlined_call_operand.vmem [shape: f32[8,4], index: 1, kind: input, shape index: {}]   ;;  %s729_s2 = inlined_call_operand.hbm [shape: f32[2,8,256], index: 2, kind: output, shape index: {}]  }
   0x1   :  { %9 = vsyncpa [#allocation3 + $0x1], 0 }
   0x2   :  { %10 = vsyncpa [#allocation4], 0 }
   0x3   :  { %12 = vsyncpa [#allocation4 + $0x1], 0  ;;  %s603_s9 = smov 0   ;;  %s605_s10 = smov 0  }
   0x4   :  { %s607_s11 = smov 0   ;;  %s609_s12 = smov 0  }
   0x5   :  { %s611_s13 = smov 0   ;;  %s613_s14 = smov 0  }
   0x6 LB: > { %s390_s15 = sadd.s32 4294967295, %s586_s14   ;;  %s391_s16 = sadd.s32 4294967294, %s586_s14   ;;  %s586_s14 = sphi %s613_s14, %s18_s14   ;;  %s582_s13 = sphi %s611_s13, %s738_s13   ;;  %s578_s12 = sphi %s609_s12, %s737_s12   ;;  %s574_s11 = sphi %s607_s11, %s736_s11   ;;  %s570_s10 = sphi %s605_s10, %s735_s10   ;;  %s566_s9 = sphi %s603_s9, %s734_s9  }
   0x7   : > { %s37_s17 = sadd.s32 1, %s582_s13  ;;  %s46_s18 = sadd.s32 1, %s574_s11 }
   0x8   : > { %p39_p0 = scmp.ge.s32.totalorder %s37_s17, 2  ;;  %p53_p1 = scmp.ne.s32.totalorder %s574_s11, %s570_s10 }
   0x9   : > { %p54_p2 = scmp.eq.s32.totalorder %s586_s14, 0  ;;  %p59_p3 = scmp.ne.s32.totalorder %s570_s10, %s566_s9 }
   0xa   : > { %s740_s17 = smov (%p39_p0, %s37_s17), 0  ;;  %p60_p5 = scmp.eq.s32.totalorder %s390_s15, 0 }
   0xb   : > { %p644_p4 = por %p54_p2, %p53_p1  ;;  %s41_s20 = ssub.s32 %s582_s13, %s740_s17 }
   0xc   : > { %p113_p6 = scmp.eq.s32.totalorder %s390_s15, 1  ;;  %p44_p7 = scmp.eq.s32.totalorder %s41_s20, 0 }
   0xd   : > { %p650_p8 = por %p60_p5, %p59_p3  ;;  %p119_p10 = scmp.eq.s32.totalorder %s391_s16, 1 }
   0xe   : > { %p654_p9 = por %p113_p6, %p53_p1  ;;  %p394_p12 = scmp.ge.s32.totalorder %s586_s14, 2 }
   0xf   : > { %s659_s23 = scalar_select %p44_p7, %s574_s11, %s46_s18  }
  0x10   : > { %p661_p11 = por %p119_p10, %p59_p3  ;;  %p424_p13 = scmp.lt.s32.totalorder %s586_s14, 2 }
  0x11   : > { %s146_s25 = sand.u32 1, %s574_s11   ;;  %s410_s27 = sshll.u32 %s582_s13, 3 }
  0x12   : > { %s395_s26 = sshll.u32 %s146_s25, 3  ;;  %s157_s30 = scalar_lea.hbm %s727_s0, %s410_s27 }
  0x13   : > { %s150_s3 = scalar_lea.vmem [#allocation2], %s395_s26  ;;  %s159_s5 = sshll.u32 %s157_s30, 4  ;;  %s160_s5 = int_to_ptr.hbm [resolvable:$true] %s159_s5 }
  0x14   : > { %s161_s4 = sshll.u32 %s150_s3, 4  ;;  %p417_p0 = pnand %p424_p13, %p644_p4  ;;  %s162_s4 = int_to_ptr.vmem [resolvable:$true] %s161_s4 }
  0x15   : > { %p398_p1 = scmp.ge.s32.totalorder %s586_s14, 1  ;;  %p166_p2 = scmp.lt.s32.totalorder %s586_s14, 3 }
  0x16   : > { %s147_s6 = scalar_lea.sflag [#allocation3], %s146_s25 }
  0x17   : > { %419 = dma.hbm_to_vmem [thread:$0]  (!%p417_p0), %s160_s5, 128, %s162_s4, %s147_s6  }
  0x18   : > { %p167_p3 = pnand %p398_p1, %p166_p2 }
  0x19   : > { %s677_s7 = sand.u32 (!%p167_p3), 1, %s570_s10  }
  0x1a   : > { %170 = sbr.rel (%p167_p3) target bundleno = 172 (0xac), region = 28  ;;  %s399_s8 = sshll.u32 (!%p167_p3), %s677_s7, 3 }
  0x1b   : > { %s173_s15 = scalar_lea.sflag (!%p167_p3), [#allocation3], %s677_s7  ;;  %s176_s16 = scalar_lea.vmem (!%p167_p3), [#allocation2], %s399_s8 }
  0x1f   : > { %557 = dma.done.wait (%p650_p8), %s173_s15, 128  }
  0x20   : > { %559 = vsyncadd (%p650_p8), %s173_s15, 4294967168  ;;  %v209_v0 = vld [vmem:[%s176_s16] sm:$0xff]  ;;  %vm218_vm0 = vcmask 1043456   ;;  %v208_v1 = vld [vmem:[%s728_s1] sm:$0xff]  ;;  %vm214_vm1 = vcmask 31744   ;;  %s400_s20 = sshll.u32 %s677_s7, 4 }
  0x21   : > { %211 = vst [vmem:[#allocation1] ss:$2 sm:$0xff] %v209_v0  ;;  %s411_s21 = sshll.u32 %s578_s12, 4  ;;  %s201_s28 = scalar_lea.vmem [#allocation5], %s400_s20 }
  0x22   : > { %s281_s27 = scalar_lea.hbm %s729_s2, %s411_s21  ;;  %s283_s29 = sshll.u32 %s201_s28, 4  ;;  %s284_s29 = int_to_ptr.vmem [resolvable:$true] %s283_s29 }
  0x23   : > { %s285_s30 = sshll.u32 %s281_s27, 4  ;;  %s266_s3 = scalar_lea.sflag [#allocation4], %s677_s7  ;;  %s286_s30 = int_to_ptr.hbm [resolvable:$true] %s285_s30 }
  0x24   : > { %s518_s4 = sshra.s32 %s286_s30, 4  ;;  %s524_s8 = scalar_lea.hbm %s729_s2, 32  ;;  %s519_s4 = int_to_ptr.hbm [resolvable:$true] %s518_s4 }
  0x25   : > { %s520_s5 = scalar_lea.hbm %s519_s4, 16  ;;  %p525_p7 = scmp.lt.s32.totalorder %s519_s4, %s729_s2 }
  0x26   : > { %p521_p4 = scmp.ne.s32.totalorder %s519_s4, %s520_s5  ;;  %p526_p8 = scmp.lt.s32.totalorder %s524_s8, %s520_s5 }
  0x28   : > { %v212_v2 = vld.sshfl [vmem:[#allocation1] sm:$0xff pattern:$0x75316420]  ;;  %v213_v3 = vld.sshfl [vmem:[#allocation1 + $0x8] sm:$0xff pattern:$0x75316420]  ;;  %p522_p5 = pnand %p521_p4, %p654_p9  ;;  %p527_p10 = por %p526_p8, %p525_p7 }
  0x29   : > { %401 = vmatpush.msk.msra.mxu0 %vm218_vm0, %v212_v2  ;;  %403 = vmatpush.msk.msra.mxu1 %vm218_vm0, %v213_v3 }
  0x2a   : > { %402 = vmatmul.msk.f32.vlgmr.msra.gmra.mxu0 %vm214_vm1, %v208_v1  ;;  %404 = vmatmul.msk.f32.vlgmr.msra.gmra.mxu1 %vm214_vm1, %v208_v1  ;;  %p523_p6 = pneg %p522_p5 }
  0x2c   : > { %p528_p13 = pnand %p527_p10, %p523_p6 }
  0xa7   : > { %v240_v4 = vpop.f32.mrf.mxu0  ;;  %v260_v5 = vpop.f32.mrf.mxu1 }
  0xa8   : > { %263 = vst [vmem:[%s201_s28] sm:$0xff] %v240_v4 }
  0xa9   : > { %264 = vst [vmem:[%s201_s28 + $0x8] sm:$0xff] %v260_v5 }
  0xaa   : > { %531 = shalt.err (!%p528_p13)
}
  0xab   : > { %414 = dma.vmem_to_hbm [thread:$0]  (%p654_p9), %s284_s29, 256, %s286_s30, %s266_s3  }
  0xac PF: > { %s297_s7 = sand.u32 1, %s566_s9   ;;  %p421_p0 = pnand %p394_p12, %p661_p11 }
  0xad   : > { %s298_s18 = scalar_lea.sflag [#allocation4], %s297_s7 }
  0xae   : > { %p422_p1 = pneg %p421_p0 }
  0xb0   : > { %561 = dma.done.wait (%p422_p1), %s298_s18, 256  }
  0xb1   : > { %563 = vsyncadd (%p422_p1), %s298_s18, 4294967040  ;;  %s18_s14 = sadd.s32 1, %s586_s14   ;;  %s734_s9 = smov %s570_s10 }
  0xb2   : > { %p15_p2 = scmp.ge.s32.totalorder %s18_s14, 4   ;;  %s735_s10 = smov %s574_s11 }
  0xb3   : > { %s736_s11 = smov %s659_s23  ;;  %s737_s12 = smov %s582_s13 }
  0xb4   : > { %s738_s13 = smov %s740_s17  ;;  %17 = sbr.rel (!%p15_p2) target bundleno = 6 (0x6), region = 76 }
  0xb9   :  { %304 = vsyncpa [#allocation3], 1 }
  0xba   :  { %306 = vsyncpa [#allocation3 + $0x1], 1 }
  0xbb   :  { %307 = vsyncpa [#allocation4], 1 }
  0xbc   :  { %309 = vsyncpa [#allocation4 + $0x1], 1 }

</bundles_post_ra>
